<compile_context>
chip_gen: v5e
topology: v5e:2x2
jax: 0.10.0
libtpu: 0.0.40
codegen_flags: <defaults>
</compile_context>

<pallas_src>
import jax
import jax.numpy as jnp
from jax import lax
from jax.experimental import pallas as pl
from jax.experimental.pallas import tpu as pltpu

LANES = 128
SUBLANES = 8
DEFAULT_MAX_TILE_ROWS = 2048      # (2048, 128) f32 = 1 MiB / input / buffer
DEFAULT_SMALL_N = 1 << 16         # below this, plain XLA beats kernel launch


def _ceil_to(x, m):
    return ((x + m - 1) // m) * m


def _make_kernel(rows, tile_rows, tiles_per_shard, needs_mask):
    """Build the kernel as a closure over the static tiling parameters."""

    def kernel(pr_ref, pi_ref, tr_ref, ti_ref, out_ref):
        c = pl.program_id(0)          # shard (parallel axis)
        i = pl.program_id(1)          # reduction step within the shard

        @pl.when(i == 0)
        def _init():
            out_ref[...] = jnp.zeros_like(out_ref)

        pr = pr_ref[...]
        pi = pi_ref[...]
        tr = tr_ref[...]
        ti = ti_ref[...]

        # Complex dot product <p|t> split into real ops (pure VPU).
        re_prod = pr * tr + pi * ti
        im_prod = pr * ti - pi * tr

        if needs_mask:
            # Ragged tail / duplicated trailing block: zero rows beyond the
            # real data.  Blocks past the end are clamped to the last valid
            # block by the index_map; this mask kills their contribution, so
            # nothing is double counted (select semantics also ignore any
            # garbage in the unspecified edge padding).
            row0 = (c * tiles_per_shard + i) * tile_rows
            rid = lax.broadcasted_iota(jnp.int32, (tile_rows, LANES), 0)
            valid = (row0 + rid) < rows
            re_prod = jnp.where(valid, re_prod, 0.0)
            im_prod = jnp.where(valid, im_prod, 0.0)

        # Fold the tile down to one (8, 128) vreg per component with VPU adds;
        # the accumulator stays vreg-sized (no tile-sized VMEM traffic).
        re_fold = re_prod.reshape(tile_rows // SUBLANES, SUBLANES, LANES).sum(axis=0)
        im_fold = im_prod.reshape(tile_rows // SUBLANES, SUBLANES, LANES).sum(axis=0)

        out_ref[0, 0, :, :] += re_fold
        out_ref[0, 1, :, :] += im_fold

    return kernel


def _prep_input(x, rows):
    """Cast to f32 and present a (rows, 128) lane-dense view.

    The reshape is free when x.size == rows * 128 (any power-of-two state with
    >= 1024 amplitudes); otherwise one zero-pad copy is made (zeros are
    neutral for the complex dot product).
    """
    x = jnp.reshape(x, (-1,))
    if x.dtype != jnp.float32:
        x = x.astype(jnp.float32)   # NOTE: f64 inputs are silently downcast.
    pad = rows * LANES - x.shape[0]
    if pad:
        x = jnp.pad(x, (0, pad))
    return x.reshape(rows, LANES)


def fidelity_loss(pred_re, pred_im, targ_re, targ_im, *,
                  max_tile_rows=DEFAULT_MAX_TILE_ROWS,
                  small_n_threshold=DEFAULT_SMALL_N):
    """loss = 1 - |<pred|target>|^2 for complex states given as (re, im)
    float pairs of shape (N,).  Any N >= 1 is supported."""
    n = pred_re.shape[0]

    if n <= small_n_threshold:
        # Small-state fast path: one fused XLA reduction beats the
        # pallas_call launch + epilogue for tiny grids.
        pr = pred_re.astype(jnp.float32)
        pi = pred_im.astype(jnp.float32)
        tr = targ_re.astype(jnp.float32)
        ti = targ_im.astype(jnp.float32)
        re = jnp.sum(pr * tr + pi * ti)
        im = jnp.sum(pr * ti - pi * tr)
        return 1.0 - (re * re + im * im)

    # ---- static tiling decisions -------------------------------------------
    rows = max(pl.cdiv(n, LANES), SUBLANES)       # lane-dense rows (>= 8)
    # Two shards let v7x's two TensorCores split this HBM-bound reduction;
    # on single-TC chips the extra grid axis just runs sequentially.
    num_shards = 2 if rows >= 2 * SUBLANES else 1
    rows_per_shard = pl.cdiv(rows, num_shards)
    tiles0 = pl.cdiv(rows_per_shard, max_tile_rows)
    tile_rows = min(_ceil_to(pl.cdiv(rows_per_shard, tiles0), SUBLANES),
                    (rows // SUBLANES) * SUBLANES)
    total_tiles = pl.cdiv(rows, tile_rows)
    tiles_per_shard = pl.cdiv(total_tiles, num_shards)
    covered_rows = num_shards * tiles_per_shard * tile_rows
    needs_mask = covered_rows != rows             # exact tiling => zero overhead
    max_block = total_tiles - 1

    def in_index(c, i):
        b = c * tiles_per_shard + i
        if needs_mask:
            b = jnp.minimum(b, max_block)         # never address a fully-OOB block
        return (b, 0)

    in_block = pl.BlockSpec((tile_rows, LANES), in_index)
    out_block = pl.BlockSpec((1, 2, SUBLANES, LANES), lambda c, i: (c, 0, 0, 0))

    args = [_prep_input(a, rows) for a in (pred_re, pred_im, targ_re, targ_im)]

    # VMEM budget: 4 inputs x 2 pipeline buffers x tile, the tiny resident
    # output block, plus headroom.  Stays far below v7x's 64 MiB physical VMEM.
    tile_bytes = tile_rows * LANES * 4
    vmem_limit = 4 * 2 * tile_bytes + 2 * (2 * SUBLANES * LANES * 4) + (8 << 20)

    kernel = _make_kernel(rows, tile_rows, tiles_per_shard, needs_mask)

    partials = pl.pallas_call(
        kernel,
        out_shape=jax.ShapeDtypeStruct((num_shards, 2, SUBLANES, LANES),
                                       jnp.float32),
        grid=(num_shards, tiles_per_shard),
        in_specs=[in_block, in_block, in_block, in_block],
        out_specs=out_block,
        compiler_params=pltpu.CompilerParams(
            dimension_semantics=("parallel", "arbitrary"),
            vmem_limit_bytes=int(vmem_limit),
        ),
    )(*args)

    # Tiny (num_shards, 2, 8, 128) cross-lane reduction + finalize in XLA.
    re = jnp.sum(partials[:, 0])
    im = jnp.sum(partials[:, 1])
    return 1.0 - (re * re + im * im)


def fidelity_loss_complex(pred_state, targ_state, **kwargs):
    """Convenience wrapper mirroring the PyTorch module's complex interface."""
    # TODO(synk): bitcast the interleaved complex64 storage to f32 and
    # de-interleave in-kernel to avoid the real()/imag() gather copies.
    return fidelity_loss(jnp.real(pred_state), jnp.imag(pred_state),
                         jnp.real(targ_state), jnp.imag(targ_state), **kwargs)


if __name__ == "__main__":
    key = jax.random.PRNGKey(0)

    def make_state(k, n):
        kr, ki = jax.random.split(k)
        re = jax.random.normal(kr, (n,), dtype=jnp.float32)
        im = jax.random.normal(ki, (n,), dtype=jnp.float32)
        norm = jnp.sqrt(jnp.sum(re * re + im * im))
        return re / norm, im / norm

    def ref_loss(pr, pi, tr, ti):
        p = pr + 1j * pi
        t = tr + 1j * ti
        return (1.0 - jnp.abs(jnp.vdot(p, t)) ** 2).astype(jnp.float32)

    cases = [
        # 12-qubit state, exact tiling, 2-way shard (force the Pallas path).
        dict(n=4096, kwargs=dict(small_n_threshold=0)),
        # Same state with tiny tiles -> multi-step accumulation per shard.
        dict(n=4096, kwargs=dict(small_n_threshold=0, max_tile_rows=8)),
        # Non-power-of-two length -> lane pad + in-kernel ragged-row mask.
        dict(n=5000, kwargs=dict(small_n_threshold=0)),
        # Small state -> pure-JAX fast path.
        dict(n=256, kwargs=dict()),
    ]

    all_ok = True
    for case in cases:
        n = case["n"]
        kp, kt, key = jax.random.split(key, 3)
        pr, pi = make_state(kp, n)
        tr, ti = make_state(kt, n)
        loss = jax.block_until_ready(
            fidelity_loss(pr, pi, tr, ti, **case["kwargs"]))
        ref = ref_loss(pr, pi, tr, ti)
        all_ok &= bool(jnp.allclose(loss, ref, atol=1e-5))

    assert all_ok
    print("KERNEL_OK")
</pallas_src>

<mosaic_0001>
module attributes {stable_mosaic.version = 11 : i64} {
  func.func @kernel(%arg0: i32, %arg1: i32, %arg2: memref<16x128xf32, #tpu.memory_space<vmem>>, %arg3: memref<16x128xf32, #tpu.memory_space<vmem>>, %arg4: memref<16x128xf32, #tpu.memory_space<vmem>>, %arg5: memref<16x128xf32, #tpu.memory_space<vmem>>, %arg6: memref<1x2x8x128xf32, #tpu.memory_space<vmem>>) attributes {dimension_semantics = [#tpu.dimension_semantics<parallel>, #tpu.dimension_semantics<arbitrary>], iteration_bounds = array<i64: 2, 1>, scalar_prefetch = 0 : i64, scratch_operands = 0 : i64, tpu.core_type = #tpu.core_type<tc>, window_params = [{transform_indices = @transform_0, window_bounds = array<i64: 16, 128>}, {transform_indices = @transform_1, window_bounds = array<i64: 16, 128>}, {transform_indices = @transform_2, window_bounds = array<i64: 16, 128>}, {transform_indices = @transform_3, window_bounds = array<i64: 16, 128>}, {transform_indices = @transform_4, window_bounds = array<i64: 1, 2, 8, 128>}]} {
    %c0_i32 = arith.constant 0 : i32
    %0 = arith.cmpi eq, %arg1, %c0_i32 : i32
    %1 = arith.extui %0 : i1 to i32
    %c0_i32_0 = arith.constant 0 : i32
    %2 = arith.cmpi ne, %1, %c0_i32_0 : i32
    scf.if %2 {
      %cst_24 = arith.constant 0.000000e+00 : f32
      %29 = vector.broadcast %cst_24 : f32 to vector<1x2x8x128xf32>
      %c0_25 = arith.constant 0 : index
      %c0_26 = arith.constant 0 : index
      %c0_27 = arith.constant 0 : index
      %c0_28 = arith.constant 0 : index
      %30 = vector.load %arg6[%c0_25, %c0_26, %c0_27, %c0_28] : memref<1x2x8x128xf32, #tpu.memory_space<vmem>>, vector<1x2x8x128xf32>
      tpu.vector_store %arg6[%c0_25, %c0_26, %c0_27, %c0_28], %29 {strides = array<i32>} : memref<1x2x8x128xf32, #tpu.memory_space<vmem>>, vector<1x2x8x128xf32>,
    } else {
    }
    %c0 = arith.constant 0 : index
    %c0_1 = arith.constant 0 : index
    %3 = vector.load %arg2[%c0, %c0_1] : memref<16x128xf32, #tpu.memory_space<vmem>>, vector<16x128xf32>
    %c0_2 = arith.constant 0 : index
    %c0_3 = arith.constant 0 : index
    %4 = vector.load %arg3[%c0_2, %c0_3] : memref<16x128xf32, #tpu.memory_space<vmem>>, vector<16x128xf32>
    %c0_4 = arith.constant 0 : index
    %c0_5 = arith.constant 0 : index
    %5 = vector.load %arg4[%c0_4, %c0_5] : memref<16x128xf32, #tpu.memory_space<vmem>>, vector<16x128xf32>
    %c0_6 = arith.constant 0 : index
    %c0_7 = arith.constant 0 : index
    %6 = vector.load %arg5[%c0_6, %c0_7] : memref<16x128xf32, #tpu.memory_space<vmem>>, vector<16x128xf32>
    %7 = arith.mulf %3, %5 : vector<16x128xf32>
    %8 = arith.mulf %4, %6 : vector<16x128xf32>
    %9 = arith.addf %7, %8 : vector<16x128xf32>
    %10 = arith.mulf %3, %6 : vector<16x128xf32>
    %11 = arith.mulf %4, %5 : vector<16x128xf32>
    %12 = arith.subf %10, %11 : vector<16x128xf32>
    %13 = vector.shape_cast %9 : vector<16x128xf32> to vector<2x8x128xf32>
    %cst = arith.constant dense<0.000000e+00> : vector<8x128xf32>
    %14 = vector.multi_reduction <add>, %13, %cst [0] : vector<2x8x128xf32> to vector<8x128xf32>
    %15 = vector.shape_cast %12 : vector<16x128xf32> to vector<2x8x128xf32>
    %cst_8 = arith.constant dense<0.000000e+00> : vector<8x128xf32>
    %16 = vector.multi_reduction <add>, %15, %cst_8 [0] : vector<2x8x128xf32> to vector<8x128xf32>
    %c0_9 = arith.constant 0 : index
    %c0_10 = arith.constant 0 : index
    %c0_11 = arith.constant 0 : index
    %c0_12 = arith.constant 0 : index
    %17 = vector.load %arg6[%c0_9, %c0_10, %c0_11, %c0_12] : memref<1x2x8x128xf32, #tpu.memory_space<vmem>>, vector<1x1x8x128xf32>
    %18 = vector.shape_cast %17 : vector<1x1x8x128xf32> to vector<8x128xf32>
    %19 = arith.addf %18, %14 : vector<8x128xf32>
    %c0_13 = arith.constant 0 : index
    %c0_14 = arith.constant 0 : index
    %c0_15 = arith.constant 0 : index
    %c0_16 = arith.constant 0 : index
    %20 = vector.load %arg6[%c0_13, %c0_14, %c0_15, %c0_16] : memref<1x2x8x128xf32, #tpu.memory_space<vmem>>, vector<1x1x8x128xf32>
    %21 = vector.shape_cast %20 : vector<1x1x8x128xf32> to vector<8x128xf32>
    %22 = vector.shape_cast %19 : vector<8x128xf32> to vector<1x1x8x128xf32>
    tpu.vector_store %arg6[%c0_13, %c0_14, %c0_15, %c0_16], %22 {strides = array<i32>} : memref<1x2x8x128xf32, #tpu.memory_space<vmem>>, vector<1x1x8x128xf32>,
    %c0_17 = arith.constant 0 : index
    %c1 = arith.constant 1 : index
    %c0_18 = arith.constant 0 : index
    %c0_19 = arith.constant 0 : index
    %23 = vector.load %arg6[%c0_17, %c1, %c0_18, %c0_19] : memref<1x2x8x128xf32, #tpu.memory_space<vmem>>, vector<1x1x8x128xf32>
    %24 = vector.shape_cast %23 : vector<1x1x8x128xf32> to vector<8x128xf32>
    %25 = arith.addf %24, %16 : vector<8x128xf32>
    %c0_20 = arith.constant 0 : index
    %c1_21 = arith.constant 1 : index
    %c0_22 = arith.constant 0 : index
    %c0_23 = arith.constant 0 : index
    %26 = vector.load %arg6[%c0_20, %c1_21, %c0_22, %c0_23] : memref<1x2x8x128xf32, #tpu.memory_space<vmem>>, vector<1x1x8x128xf32>
    %27 = vector.shape_cast %26 : vector<1x1x8x128xf32> to vector<8x128xf32>
    %28 = vector.shape_cast %25 : vector<8x128xf32> to vector<1x1x8x128xf32>
    tpu.vector_store %arg6[%c0_20, %c1_21, %c0_22, %c0_23], %28 {strides = array<i32>} : memref<1x2x8x128xf32, #tpu.memory_space<vmem>>, vector<1x1x8x128xf32>,
    return
  }
  func.func @transform_0(%arg0: i32, %arg1: i32) -> (i32, i32) {
    %c1_i32 = arith.constant 1 : i32
    %0 = arith.muli %arg0, %c1_i32 : i32
    %1 = arith.addi %0, %arg1 : i32
    %c0_i32 = arith.constant 0 : i32
    %c0_i32_0 = arith.constant 0 : i32
    return %1, %c0_i32 : i32, i32
  }
  func.func @transform_1(%arg0: i32, %arg1: i32) -> (i32, i32) {
    %c1_i32 = arith.constant 1 : i32
    %0 = arith.muli %arg0, %c1_i32 : i32
    %1 = arith.addi %0, %arg1 : i32
    %c0_i32 = arith.constant 0 : i32
    %c0_i32_0 = arith.constant 0 : i32
    return %1, %c0_i32 : i32, i32
  }
  func.func @transform_2(%arg0: i32, %arg1: i32) -> (i32, i32) {
    %c1_i32 = arith.constant 1 : i32
    %0 = arith.muli %arg0, %c1_i32 : i32
    %1 = arith.addi %0, %arg1 : i32
    %c0_i32 = arith.constant 0 : i32
    %c0_i32_0 = arith.constant 0 : i32
    return %1, %c0_i32 : i32, i32
  }
  func.func @transform_3(%arg0: i32, %arg1: i32) -> (i32, i32) {
    %c1_i32 = arith.constant 1 : i32
    %0 = arith.muli %arg0, %c1_i32 : i32
    %1 = arith.addi %0, %arg1 : i32
    %c0_i32 = arith.constant 0 : i32
    %c0_i32_0 = arith.constant 0 : i32
    return %1, %c0_i32 : i32, i32
  }
  func.func @transform_4(%arg0: i32, %arg1: i32) -> (i32, i32, i32, i32) {
    %c0_i32 = arith.constant 0 : i32
    %c0_i32_0 = arith.constant 0 : i32
    %c0_i32_1 = arith.constant 0 : i32
    %c0_i32_2 = arith.constant 0 : i32
    return %arg0, %c0_i32, %c0_i32_0, %c0_i32_1 : i32, i32, i32, i32
  }
}

</mosaic_0001>

<bundles_post_ra>
// kernel: tpu_custom_call.1
= control target key start
LH: loop header
LB: loop body
LE: loop exit
PB: predicated region body
PF: predicated region fallthrough
CT: control target
= control target key end

     0   :  { %s1130_s0 = inlined_call_operand.hbm [shape: f32[32,128], index: 0, kind: input, shape index: {}]   ;;  %s1131_s1 = inlined_call_operand.hbm [shape: f32[32,128], index: 1, kind: input, shape index: {}]   ;;  %s1132_s2 = inlined_call_operand.hbm [shape: f32[32,128], index: 2, kind: input, shape index: {}]   ;;  %s1133_s3 = inlined_call_operand.hbm [shape: f32[32,128], index: 3, kind: input, shape index: {}]   ;;  %s1134_s4 = inlined_call_operand.hbm [shape: f32[2,2,8,128], index: 4, kind: output, shape index: {}]  }
   0x1   :  { %1140 = sst [smem:[#allocation20_spill]] %s1130_s0 }
   0x2   :  { %1141 = sst [smem:[#allocation21_spill]] %s1131_s1 }
   0x3   :  { %9 = vsyncpa [#allocation3], 0 }
   0x4   :  { %11 = vsyncpa [#allocation3 + $0x1], 0 }
   0x5   :  { %12 = vsyncpa [#allocation6], 0 }
   0x6   :  { %14 = vsyncpa [#allocation6 + $0x1], 0 }
   0x7   :  { %15 = vsyncpa [#allocation9], 0 }
   0x8   :  { %17 = vsyncpa [#allocation9 + $0x1], 0 }
   0x9   :  { %18 = vsyncpa [#allocation4], 0 }
   0xa   :  { %20 = vsyncpa [#allocation4 + $0x1], 0  ;;  %s932_s15 = smov 0   ;;  %s934_s16 = smov 0  }
   0xb   :  { %s936_s17 = smov 0   ;;  %s938_s18 = smov 0  }
   0xc   :  { %s940_s19 = smov 0   ;;  %s942_s20 = smov 0  }
   0xd LB: > { %1142 = sst [smem:[#allocation15_spill]] %s889_s17  ;;  %s963_s21 = sadd.s32 4294967295, %s901_s20   ;;  %s901_s20 = sphi %s942_s20, %s26_s20   ;;  %s897_s19 = sphi %s940_s19, %s1159_s19   ;;  %s893_s18 = sphi %s938_s18, %s1158_s18   ;;  %s889_s17 = sphi %s936_s17, %s1157_s17   ;;  %s885_s16 = sphi %s934_s16, %s1161_s16   ;;  %s881_s15 = sphi %s932_s15, %s1160_s15  }
   0xe   : > { %1143 = sst [smem:[#allocation16_spill]] %s897_s19  ;;  %s576_s22 = sadd.s32 4294967294, %s901_s20  }
   0xf   : > { %1144 = sst [smem:[#allocation17_spill]] %s901_s20  ;;  %s38_s23 = sadd.s32 1, %s897_s19 }
  0x10   : > { %s47_s24 = sadd.s32 1, %s889_s17  ;;  %p40_p0 = scmp.ge.s32.totalorder %s38_s23, 2 }
  0x11   : > { %p54_p1 = scmp.ne.s32.totalorder %s889_s17, %s885_s16  ;;  %p55_p2 = scmp.eq.s32.totalorder %s901_s20, 0 }
  0x12   : > { %p60_p3 = scmp.ne.s32.totalorder %s885_s16, %s881_s15  ;;  %s1163_s23 = smov (%p40_p0, %s38_s23), 0 }
  0x13   : > { %1145 = sst [smem:[#allocation18_spill]] %s1163_s23  ;;  %p975_p4 = por %p55_p2, %p54_p1 }
  0x14   : > { %p61_p5 = scmp.eq.s32.totalorder %s963_s21, 0  ;;  %s44_s26 = ssub.s32 %s897_s19, %s1163_s23 }
  0x15   : > { %p168_p6 = scmp.eq.s32.totalorder %s963_s21, 1  ;;  %p45_p7 = scmp.eq.s32.totalorder %s44_s26, 0 }
  0x16   : > { %p983_p8 = por %p61_p5, %p60_p3  ;;  %p174_p10 = scmp.eq.s32.totalorder %s576_s22, 1 }
  0x17   : > { %p987_p9 = por %p168_p6, %p54_p1  ;;  %p578_p12 = scmp.ge.s32.totalorder %s901_s20, 2 }
  0x18   : > { %s992_s29 = scalar_select %p45_p7, %s889_s17, %s47_s24  }
  0x19   : > { %p994_p11 = por %p174_p10, %p60_p3  ;;  %p636_p13 = scmp.lt.s32.totalorder %s901_s20, 2 }
  0x1a   : > { %1149 = sst [smem:[#allocation19_spill]] %s992_s29  ;;  %s1001_s5 = sand.u32 1, %s889_s17  }
  0x1b   : > { %s1004_s6 = sshll.u32 %s1001_s5, 4  ;;  %s1007_s7 = sshll.u32 %s897_s19, 4 }
  0x1c   : > { %p1011_p0 = pnand %p636_p13, %p975_p4  ;;  %s217_s9 = sand.u32 1, %s901_s20  }
  0x1d   : > { %s1152_s1 = sld [smem:[#allocation21_spill]]  ;;  %s221_s14 = scalar_lea.vmem [#allocation5], %s1004_s6 }
  0x1e   : > { %s230_s22 = sshll.u32 %s221_s14, 4  ;;  %s218_s24 = scalar_lea.sflag [#allocation6], %s217_s9  ;;  %s231_s22 = int_to_ptr.vmem [resolvable:$true] %s230_s22 }
  0x1f   : > { %s903_s25 = smov 128   ;;  %s904_s26 = smov 8  }
  0x20   : > { %p591_p1 = scmp.ge.s32.totalorder %s901_s20, 1  ;;  %p284_p2 = scmp.lt.s32.totalorder %s901_s20, 3 }
  0x21   : > { %s1154_s0 = sld [smem:[#allocation20_spill]]  ;;  %s250_s11 = scalar_lea.hbm %s1132_s2, %s1007_s7 }
  0x22   : > { %p1028_p3 = pnand %p591_p1, %p284_p2  ;;  %s273_s17 = scalar_lea.hbm %s1133_s3, %s1007_s7 }
  0x23   : > { %s227_s12 = scalar_lea.hbm %s1152_s1, %s1007_s7  ;;  %s198_s1 = scalar_lea.vmem [#allocation2], %s1004_s6 }
  0x24   : > { %s228_s13 = sshll.u32 %s227_s12, 4  ;;  %s207_s23 = sshll.u32 %s198_s1, 4  ;;  %s229_s13 = int_to_ptr.hbm [resolvable:$true] %s228_s13  ;;  %s208_s23 = int_to_ptr.vmem [resolvable:$true] %s207_s23 }
  0x25   : > { %625 = dma.hbm_to_vmem [thread:$0]  (!%p1011_p0), %s229_s13, 256, %s231_s22, %s218_s24, %s903_s25, %s903_s25, %s904_s26  }
  0x26   : > { %s195_s13 = scalar_lea.sflag [#allocation3], %s1001_s5  ;;  %s251_s12 = sshll.u32 %s250_s11, 4  ;;  %s252_s12 = int_to_ptr.hbm [resolvable:$true] %s251_s12 }
  0x27   : > { %s204_s9 = scalar_lea.hbm %s1154_s0, %s1007_s7  ;;  %s244_s0 = scalar_lea.vmem [#allocation7], %s1004_s6 }
  0x28   : > { %s205_s14 = sshll.u32 %s204_s9, 4  ;;  %s253_s29 = sshll.u32 %s244_s0, 4  ;;  %s206_s14 = int_to_ptr.hbm [resolvable:$true] %s205_s14  ;;  %s254_s29 = int_to_ptr.vmem [resolvable:$true] %s253_s29 }
  0x29   : > { %622 = dma.hbm_to_vmem [thread:$0]  (!%p1011_p0), %s206_s14, 256, %s208_s23, %s195_s13, %s903_s25, %s903_s25, %s904_s26  }
  0x2a   : > { %628 = dma.hbm_to_vmem [thread:$0]  (!%p1011_p0), %s252_s12, 256, %s254_s29, %s218_s24, %s903_s25, %s903_s25, %s904_s26  }
  0x2b   : > { %s267_s20 = scalar_lea.vmem [#allocation8], %s1004_s6  ;;  %s274_s14 = sshll.u32 %s273_s17, 4  ;;  %s275_s14 = int_to_ptr.hbm [resolvable:$true] %s274_s14 }
  0x2c   : > { %s276_s23 = sshll.u32 %s267_s20, 4  ;;  %s264_s19 = scalar_lea.sflag [#allocation9], %s1001_s5  ;;  %s277_s23 = int_to_ptr.vmem [resolvable:$true] %s276_s23 }
  0x2d   : > { %631 = dma.hbm_to_vmem [thread:$0]  (!%p1011_p0), %s275_s14, 256, %s277_s23, %s264_s19, %s903_s25, %s903_s25, %s904_s26  }
  0x2e   : > { %288 = sbr.rel (%p1028_p3) target bundleno = 74 (0x4a), region = 36  ;;  %s1067_s0 = sand.u32 (!%p1028_p3), 1, %s885_s16  }
  0x2f   : > { %s1070_s29 = sshll.u32 (!%p1028_p3), %s1067_s0, 4  ;;  %s291_s17 = scalar_lea.sflag (!%p1028_p3), [#allocation3], %s1067_s0 }
  0x30   : > { %s294_s20 = scalar_lea.vmem (!%p1028_p3), [#allocation2], %s1070_s29 }
  0x33   : > { %864 = dma.done.wait (%p983_p8), %s291_s17, 256  }
  0x34   : > { %866 = vsyncadd (%p983_p8), %s291_s17, 4294967040  ;;  %s300_s5 = sand.u32 1, %s963_s21   ;;  %s304_s7 = scalar_lea.vmem [#allocation5], %s1070_s29 }
  0x35   : > { %s301_s6 = scalar_lea.sflag [#allocation6], %s300_s5 }
  0x36   : > { %868 = dma.done.wait (%p983_p8), %s301_s6, 512  }
  0x37   : > { %870 = vsyncadd (%p983_p8), %s301_s6, 4294966784  ;;  %s314_s8 = scalar_lea.vmem [#allocation7], %s1070_s29  ;;  %s321_s24 = scalar_lea.sflag [#allocation9], %s1067_s0 }
  0x38   : > { %s324_s25 = scalar_lea.vmem [#allocation8], %s1070_s29 }
  0x39   : > { %872 = dma.done.wait (%p983_p8), %s321_s24, 256  }
  0x3a   : > { %874 = vsyncadd (%p983_p8), %s321_s24, 4294967040  ;;  %v379_v0 = vld [vmem:[%s294_s20] sm:$0xff]  ;;  %v380_v1 = vld [vmem:[%s294_s20 + $0x8] sm:$0xff]  ;;  %s608_s21 = sshll.u32 %s893_s18, 4  ;;  %s364_s18 = scalar_lea.vmem [#allocation10], %s1070_s29 }
  0x3b   : > { %v381_v2 = vld [vmem:[%s304_s7] sm:$0xff]  ;;  %v382_v3 = vld [vmem:[%s304_s7 + $0x8] sm:$0xff]  ;;  %s420_s10 = scalar_lea.hbm %s1134_s4, %s608_s21  ;;  %s421_s13 = sshll.u32 %s364_s18, 4  ;;  %s422_s13 = int_to_ptr.vmem [resolvable:$true] %s421_s13 }
  0x3c   : > { %v383_v4 = vld [vmem:[%s314_s8] sm:$0xff]  ;;  %v384_v5 = vld [vmem:[%s314_s8 + $0x8] sm:$0xff]  ;;  %s423_s22 = sshll.u32 %s420_s10, 4  ;;  %s409_s11 = scalar_lea.sflag [#allocation4], %s1067_s0  ;;  %s424_s22 = int_to_ptr.hbm [resolvable:$true] %s423_s22 }
  0x3d   : > { %v385_v6 = vld [vmem:[%s324_s25] sm:$0xff]  ;;  %v386_v7 = vld [vmem:[%s324_s25 + $0x8] sm:$0xff]  ;;  %v387_v8 = vmul.f32 %v383_v4, %v379_v0  ;;  %v388_v9 = vmul.f32 %v384_v5, %v380_v1  ;;  %v395_v10 = vmul.f32 %v383_v4, %v381_v2  ;;  %v396_v11 = vmul.f32 %v384_v5, %v382_v3  ;;  %s825_s12 = sshra.s32 %s424_s22, 4  ;;  %s831_s14 = scalar_lea.hbm %s1134_s4, 32  ;;  %s826_s12 = int_to_ptr.hbm [resolvable:$true] %s825_s12 }
  0x3e   : > { %v389_v12 = vmul.f32 %v385_v6, %v381_v2  ;;  %v390_v13 = vmul.f32 %v386_v7, %v382_v3  ;;  %v393_v14 = vmul.f32 %v385_v6, %v379_v0  ;;  %v394_v15 = vmul.f32 %v386_v7, %v380_v1  ;;  %s827_s1 = scalar_lea.hbm %s826_s12, 16  ;;  %p832_p7 = scmp.lt.s32.totalorder %s826_s12, %s1134_s4 }
  0x3f   : > { %p828_p4 = scmp.ne.s32.totalorder %s826_s12, %s827_s1  ;;  %p833_p8 = scmp.lt.s32.totalorder %s831_s14, %s827_s1 }
  0x40   : > { %v391_v16 = vadd.f32 %v389_v12, %v387_v8  ;;  %v392_v17 = vadd.f32 %v390_v13, %v388_v9  ;;  %v397_v18 = vsub.f32 %v393_v14, %v395_v10  ;;  %v398_v19 = vsub.f32 %v394_v15, %v396_v11 }
  0x41   : > { %p829_p5 = pnand %p828_p4, %p987_p9  ;;  %p834_p10 = por %p833_p8, %p832_p7 }
  0x42   : > { %v399_v20 = vadd.f32 %v392_v17, %v391_v16  ;;  %v400_v21 = vadd.f32 %v398_v19, %v397_v18 }
  0x43   : > { %p830_p6 = pneg %p829_p5 }
  0x44   : > { %403 = vst [vmem:[%s364_s18] sm:$0xff] %v399_v20 }
  0x45   : > { %598 = vst [vmem:[%s364_s18 + $0x8] sm:$0xff] %v400_v21  ;;  %p835_p13 = pnand %p834_p10, %p830_p6 }
  0x47   : > { %838 = shalt.err (!%p835_p13)
}
  0x48   : > { %s905_s0 = smov 128   ;;  %s906_s17 = smov 8  }
  0x49   : > { %617 = dma.vmem_to_hbm [thread:$0]  (%p987_p9), %s422_s13, 256, %s424_s22, %s409_s11, %s905_s0, %s905_s0, %s906_s17  }
  0x4a PF: > { %s1155_s20 = sld [smem:[#allocation17_spill]]  ;;  %s438_s5 = sand.u32 1, %s881_s15  }
  0x4b   : > { %p633_p0 = pnand %p578_p12, %p994_p11  ;;  %s439_s6 = scalar_lea.sflag [#allocation4], %s438_s5 }
  0x4d   : > { %p634_p1 = pneg %p633_p0 }
  0x4f   : > { %876 = dma.done.wait (%p634_p1), %s439_s6, 256  }
  0x50   : > { %878 = vsyncadd (%p634_p1), %s439_s6, 4294967040  ;;  %s26_s20 = sadd.s32 1, %s1155_s20   ;;  %s1156_s7 = sld [smem:[#allocation15_spill]] }
  0x51   : > { %p23_p2 = scmp.ge.s32.totalorder %s26_s20, 4   ;;  %s1157_s17 = sld [smem:[#allocation19_spill]] }
  0x52   : > { %s1158_s18 = sld [smem:[#allocation16_spill]]  ;;  %s1160_s15 = smov %s885_s16 }
  0x53   : > { %s1159_s19 = sld [smem:[#allocation18_spill]]  ;;  %25 = sbr.rel (!%p23_p2) target bundleno = 13 (0xd), region = 123 }
  0x56   : > { %s1161_s16 = smov %s1156_s7 }
  0x58   :  { %445 = vsyncpa [#allocation3], 1 }
  0x59   :  { %447 = vsyncpa [#allocation3 + $0x1], 1 }
  0x5a   :  { %448 = vsyncpa [#allocation6], 1 }
  0x5b   :  { %450 = vsyncpa [#allocation6 + $0x1], 1 }
  0x5c   :  { %451 = vsyncpa [#allocation9], 1 }
  0x5d   :  { %453 = vsyncpa [#allocation9 + $0x1], 1 }
  0x5e   :  { %454 = vsyncpa [#allocation4], 1 }
  0x5f   :  { %456 = vsyncpa [#allocation4 + $0x1], 1 }

</bundles_post_ra>
